<compile_context>
chip_gen: v7x
topology: tpu7x:2x2x1
jax: 0.10.0
libtpu: 0.0.40
codegen_flags: <defaults>
</compile_context>

<pallas_src>
import math

import jax
import jax.numpy as jnp
from jax.experimental import pallas as pl
from jax.experimental.pallas import tpu as pltpu


def _round_up(x, m):
    return ((x + m - 1) // m) * m


def _pad2d(x, rows, cols):
    pr, pc = rows - x.shape[0], cols - x.shape[1]
    if pr == 0 and pc == 0:
        return x
    return jnp.pad(x, ((0, pr), (0, pc)))


# ---------------------------------------------------------------------------
# Kernel 1: dinv = D^{-1/2}, tiled row-reduction of the adjacency.
# grid = (row tiles, col tiles); col (reduction) axis is last / "arbitrary".
# ---------------------------------------------------------------------------
def _dinv_kernel(adj_ref, dinv_ref, acc_ref):
    k = pl.program_id(1)

    @pl.when(k == 0)
    def _():
        acc_ref[...] = jnp.zeros_like(acc_ref)

    # Accumulate the degree in f32 regardless of the adjacency operand dtype.
    acc_ref[...] += jnp.sum(adj_ref[...].astype(jnp.float32), axis=1, keepdims=True)

    @pl.when(k == pl.num_programs(1) - 1)
    def _():
        deg = acc_ref[...]
        dinv_ref[...] = jnp.where(deg > 0.0, jax.lax.rsqrt(deg), 0.0)


# ---------------------------------------------------------------------------
# Kernel 2: xws = dinv * (x @ W_padded).  Small matmul, f32 operands, row-tiled.
# Output is cast to the operand dtype used for the dominant matmul.
# ---------------------------------------------------------------------------
def _xw_kernel(x_ref, w_ref, dinv_ref, xws_ref):
    xw = jnp.dot(x_ref[...], w_ref[...], preferred_element_type=jnp.float32)
    xws_ref[...] = (dinv_ref[...] * xw).astype(xws_ref.dtype)


# ---------------------------------------------------------------------------
# Kernel 3: out = dinv * (adj @ xws) + b.  Dominant matmul, f32 VMEM accumulator,
# pl.when init/finalize, lane-dense (padded) output.
# ---------------------------------------------------------------------------
def _agg_kernel(adj_ref, xws_ref, dinv_ref, b_ref, out_ref, acc_ref):
    k = pl.program_id(1)

    @pl.when(k == 0)
    def _():
        acc_ref[...] = jnp.zeros_like(acc_ref)

    acc_ref[...] += jnp.dot(adj_ref[...], xws_ref[...],
                            preferred_element_type=jnp.float32)

    @pl.when(k == pl.num_programs(1) - 1)
    def _():
        out_ref[...] = (dinv_ref[...] * acc_ref[...] + b_ref[...]).astype(out_ref.dtype)


def gcn_conv(adj, node_ft, weight, bias, *, block_m=128, block_k=128,
             operand_dtype=jnp.float32):
    """GCNConv forward: D^{-1/2} A D^{-1/2} @ node_ft @ W + b."""
    N, Fin = node_ft.shape
    Fout = weight.shape[1]

    # Pad N so both the row tile and the contraction tile divide it, and pad Fout
    # to a lane-dense multiple of 128 (unmasked vector stores).  Zero padding is
    # exact: padded nodes have degree 0 -> dinv 0, padded columns contribute 0.
    n_tile = math.lcm(block_m, block_k)
    N_pad = _round_up(N, n_tile)
    F_pad = _round_up(Fout, 128)

    adj_p = _pad2d(adj.astype(jnp.float32), N_pad, N_pad)
    x_p = _pad2d(node_ft.astype(jnp.float32), N_pad, Fin)
    w_p = _pad2d(weight.astype(jnp.float32), Fin, F_pad)
    b_p = _pad2d(bias.reshape(1, Fout).astype(jnp.float32), 1, F_pad)

    # Narrow dtype (e.g. bf16 on v6e/v7x) only for the operands of the dominant
    # adjacency matmul; adjacency entries (0/1) are exactly representable.
    adj_op = adj_p.astype(operand_dtype)

    nm = N_pad // block_m
    nk = N_pad // block_k

    # --- Kernel 1: D^{-1/2} -------------------------------------------------
    dinv = pl.pallas_call(
        _dinv_kernel,
        out_shape=jax.ShapeDtypeStruct((N_pad, 1), jnp.float32),
        grid=(nm, nk),
        in_specs=[pl.BlockSpec((block_m, block_k), lambda i, k: (i, k))],
        out_specs=pl.BlockSpec((block_m, 1), lambda i, k: (i, 0)),
        scratch_shapes=[pltpu.VMEM((block_m, 1), jnp.float32)],
        compiler_params=pltpu.CompilerParams(
            dimension_semantics=("parallel", "arbitrary")),
    )(adj_op)

    # --- Kernel 2: xws = dinv * (x @ W) --------------------------------------
    xws = pl.pallas_call(
        _xw_kernel,
        out_shape=jax.ShapeDtypeStruct((N_pad, F_pad), operand_dtype),
        grid=(nm,),
        in_specs=[
            pl.BlockSpec((block_m, Fin), lambda i: (i, 0)),
            pl.BlockSpec((Fin, F_pad), lambda i: (0, 0)),
            pl.BlockSpec((block_m, 1), lambda i: (i, 0)),
        ],
        out_specs=pl.BlockSpec((block_m, F_pad), lambda i: (i, 0)),
        compiler_params=pltpu.CompilerParams(
            dimension_semantics=("parallel",)),
    )(x_p, w_p, dinv)

    # --- Kernel 3: out = dinv * (adj @ xws) + b ------------------------------
    out = pl.pallas_call(
        _agg_kernel,
        out_shape=jax.ShapeDtypeStruct((N_pad, F_pad), jnp.float32),
        grid=(nm, nk),
        in_specs=[
            pl.BlockSpec((block_m, block_k), lambda i, k: (i, k)),
            pl.BlockSpec((block_k, F_pad), lambda i, k: (k, 0)),
            pl.BlockSpec((block_m, 1), lambda i, k: (i, 0)),
            pl.BlockSpec((1, F_pad), lambda i, k: (0, 0)),
        ],
        out_specs=pl.BlockSpec((block_m, F_pad), lambda i, k: (i, 0)),
        scratch_shapes=[pltpu.VMEM((block_m, F_pad), jnp.float32)],
        compiler_params=pltpu.CompilerParams(
            dimension_semantics=("parallel", "arbitrary")),
    )(adj_op, xws, dinv, b_p)

    return out[:N, :Fout]


def reference(adj, node_ft, weight, bias):
    deg = jnp.sum(adj, axis=1, keepdims=True)
    dinv = jnp.where(deg > 0.0, 1.0 / jnp.sqrt(deg), 0.0)
    lap = dinv * adj * dinv.T
    return lap @ node_ft @ weight + bias


if __name__ == "__main__":
    key = jax.random.PRNGKey(0)
    k_adj, k_x, k_w = jax.random.split(key, 3)

    N = 256            # number of graph nodes
    in_channels = 64
    out_channels = 32

    # deterministic example inputs
    a = (jax.random.uniform(k_adj, (N, N)) < 0.1).astype(jnp.float32)
    adj = jnp.maximum(a, a.T)                                  # symmetric adjacency
    adj = adj.at[jnp.arange(N), jnp.arange(N)].set(1.0)        # self loops -> no zero degree
    node_ft = jax.random.normal(k_x, (N, in_channels), dtype=jnp.float32)

    # parameters (module shapes; xavier-normal weight, small nonzero bias so the
    # bias-add and padding-strip paths are actually exercised)
    xavier_std = (2.0 / (in_channels + out_channels)) ** 0.5
    weight = xavier_std * jax.random.normal(k_w, (in_channels, out_channels),
                                            dtype=jnp.float32)
    bias = 0.01 * jnp.arange(out_channels, dtype=jnp.float32)

    ref = reference(adj, node_ft, weight, bias)

    # f32 operands: tight structural / numerical check
    out_f32 = jax.block_until_ready(
        gcn_conv(adj, node_ft, weight, bias, operand_dtype=jnp.float32))
    assert out_f32.shape == (N, out_channels)
    assert jnp.allclose(out_f32, ref, atol=1e-4, rtol=1e-4), "f32 mismatch vs reference"

    # bf16 operands on the dominant adjacency matmul (v6e/v7x MXU fast path)
    out_bf16 = jax.block_until_ready(
        gcn_conv(adj, node_ft, weight, bias, operand_dtype=jnp.bfloat16))
    assert jnp.allclose(out_bf16, ref, atol=5e-2, rtol=5e-2), "bf16 mismatch vs reference"

    print("KERNEL_OK")
</pallas_src>

<mosaic_0001>
module attributes {stable_mosaic.version = 11 : i64} {
  func.func @_dinv_kernel(%arg0: i32, %arg1: i32, %arg2: memref<128x128xf32, #tpu.memory_space<vmem>>, %arg3: memref<128x1xf32, #tpu.memory_space<vmem>>, %arg4: memref<128x1xf32, #tpu.memory_space<vmem>>) attributes {dimension_semantics = [#tpu.dimension_semantics<parallel>, #tpu.dimension_semantics<arbitrary>], iteration_bounds = array<i64: 2, 2>, scalar_prefetch = 0 : i64, scratch_operands = 1 : i64, tpu.core_type = #tpu.core_type<tc>, window_params = [{transform_indices = @transform_0, window_bounds = array<i64: 128, 128>}, {transform_indices = @transform_1, window_bounds = array<i64: 128, 1>}]} {
    %c0_i32 = arith.constant 0 : i32
    %0 = arith.cmpi eq, %arg1, %c0_i32 : i32
    %1 = arith.extui %0 : i1 to i32
    %c0_i32_0 = arith.constant 0 : i32
    %2 = arith.cmpi ne, %1, %c0_i32_0 : i32
    scf.if %2 {
      %cst_7 = arith.constant 0.000000e+00 : f32
      %12 = vector.broadcast %cst_7 : f32 to vector<128x1xf32>
      %c0_8 = arith.constant 0 : index
      %c0_9 = arith.constant 0 : index
      %13 = vector.load %arg4[%c0_8, %c0_9] : memref<128x1xf32, #tpu.memory_space<vmem>>, vector<128x1xf32>
      tpu.vector_store %arg4[%c0_8, %c0_9], %12 {strides = array<i32>} : memref<128x1xf32, #tpu.memory_space<vmem>>, vector<128x1xf32>,
    } else {
    }
    %c0 = arith.constant 0 : index
    %c0_1 = arith.constant 0 : index
    %3 = vector.load %arg4[%c0, %c0_1] : memref<128x1xf32, #tpu.memory_space<vmem>>, vector<128x1xf32>
    %c0_2 = arith.constant 0 : index
    %c0_3 = arith.constant 0 : index
    %4 = vector.load %arg2[%c0_2, %c0_3] : memref<128x128xf32, #tpu.memory_space<vmem>>, vector<128x128xf32>
    %cst = arith.constant dense<0.000000e+00> : vector<128xf32>
    %5 = vector.multi_reduction <add>, %4, %cst [1] : vector<128x128xf32> to vector<128xf32>
    %6 = vector.shape_cast %5 : vector<128xf32> to vector<128x1xf32>
    %7 = arith.addf %3, %6 : vector<128x1xf32>
    %c0_4 = arith.constant 0 : index
    %c0_5 = arith.constant 0 : index
    %8 = vector.load %arg4[%c0_4, %c0_5] : memref<128x1xf32, #tpu.memory_space<vmem>>, vector<128x1xf32>
    tpu.vector_store %arg4[%c0_4, %c0_5], %7 {strides = array<i32>} : memref<128x1xf32, #tpu.memory_space<vmem>>, vector<128x1xf32>,
    %c1_i32 = arith.constant 1 : i32
    %9 = arith.cmpi eq, %arg1, %c1_i32 : i32
    %10 = arith.extui %9 : i1 to i32
    %c0_i32_6 = arith.constant 0 : i32
    %11 = arith.cmpi ne, %10, %c0_i32_6 : i32
    scf.if %11 {
      %c0_7 = arith.constant 0 : index
      %c0_8 = arith.constant 0 : index
      %12 = vector.load %arg4[%c0_7, %c0_8] : memref<128x1xf32, #tpu.memory_space<vmem>>, vector<128x1xf32>
      %cst_9 = arith.constant 0.000000e+00 : f32
      %13 = vector.broadcast %cst_9 : f32 to vector<128x1xf32>
      %14 = arith.cmpf ogt, %12, %13 : vector<128x1xf32>
      %15 = math.rsqrt %12 : vector<128x1xf32>
      %cst_10 = arith.constant 0.000000e+00 : f32
      %16 = vector.broadcast %cst_10 : f32 to vector<128x1xf32>
      %17 = arith.select %14, %15, %16 : vector<128x1xi1>, vector<128x1xf32>
      %c0_11 = arith.constant 0 : index
      %c0_12 = arith.constant 0 : index
      %18 = vector.load %arg3[%c0_11, %c0_12] : memref<128x1xf32, #tpu.memory_space<vmem>>, vector<128x1xf32>
      tpu.vector_store %arg3[%c0_11, %c0_12], %17 {strides = array<i32>} : memref<128x1xf32, #tpu.memory_space<vmem>>, vector<128x1xf32>,
    } else {
    }
    return
  }
  func.func @transform_0(%arg0: i32, %arg1: i32) -> (i32, i32) {
    %c0_i32 = arith.constant 0 : i32
    return %arg0, %arg1 : i32, i32
  }
  func.func @transform_1(%arg0: i32, %arg1: i32) -> (i32, i32) {
    %c0_i32 = arith.constant 0 : i32
    %c0_i32_0 = arith.constant 0 : i32
    return %arg0, %c0_i32 : i32, i32
  }
}

</mosaic_0001>

<bundles_post_ra>
// kernel: tpu_custom_call.1
= control target key start
LH: loop header
LB: loop body
LE: loop exit
PB: predicated region body
PF: predicated region fallthrough
CT: control target
= control target key end

     0   :  { %6 = vsyncpa [#allocation4], 0  ;;  %s913_s0 = inlined_call_operand.hbm [shape: f32[256,256], index: 0, kind: input, shape index: {}]   ;;  %s914_s1 = inlined_call_operand.vmem [shape: f32[256,1], index: 1, kind: output, shape index: {}]  }
   0x1   :  { %8 = vsyncpa [#allocation4 + $0x1], 0  ;;  %s675_s6 = smov 0   ;;  %s677_s7 = smov 0  }
   0x2   :  { %s679_s8 = smov 0   ;;  %s681_s9 = smov 0  }
   0x3   :  { %s683_s10 = smov 0   ;;  %s685_s11 = smov 0  }
   0x4   :  { %s687_s12 = smov 0   ;;  %s689_s13 = smov 0  }
   0x5 LB: > { %s438_s14 = sadd.s32 4294967295, %s658_s13   ;;  %s23_s15 = sadd.s32 1, %s650_s11  ;;  %s658_s13 = sphi %s689_s13, %s14_s13   ;;  %s654_s12 = sphi %s687_s12, %s925_s12   ;;  %s650_s11 = sphi %s685_s11, %s924_s11   ;;  %s646_s10 = sphi %s683_s10, %s923_s10   ;;  %s642_s9 = sphi %s681_s9, %s922_s9   ;;  %s638_s8 = sphi %s679_s8, %s921_s8   ;;  %s634_s7 = sphi %s677_s7, %s920_s7   ;;  %s630_s6 = sphi %s675_s6, %s919_s6  }
   0x6   : > { %p24_p0 = scmp.ge.s32.totalorder %s23_s15, 2  ;;  %s26_s16 = sadd.s32 1, %s654_s12 }
   0x7   : > { %s35_s17 = sadd.s32 1, %s638_s8  ;;  %p42_p1 = scmp.ne.s32.totalorder %s638_s8, %s634_s7 }
   0x8   : > { %s927_s15 = smov (%p24_p0, %s23_s15), 0  ;;  %s929_s16 = smov (!%p24_p0, %s26_s16), %s654_s12 }
   0x9   : > { %s31_s18 = ssub.s32 %s650_s11, %s927_s15  ;;  %p43_p2 = scmp.eq.s32.totalorder %s658_s13, 0 }
   0xa   : > { %p28_p3 = scmp.ge.s32.totalorder %s929_s16, 2  ;;  %p48_p4 = scmp.ne.s32.totalorder %s634_s7, %s630_s6 }
   0xb   : > { %p726_p5 = por %p43_p2, %p42_p1  ;;  %p49_p6 = scmp.eq.s32.totalorder %s438_s14, 0 }
   0xc   : > { %s931_s16 = smov (%p28_p3, %s929_s16), 0  ;;  %p461_p8 = scmp.lt.s32.totalorder %s658_s13, 4 }
   0xd   : > { %p732_p7 = por %p49_p6, %p48_p4  ;;  %s30_s21 = ssub.s32 %s654_s12, %s931_s16 }
   0xe   : > { %s32_s22 = sor.u32 %s31_s18, %s30_s21  ;;  %s98_s23 = sand.u32 1, %s638_s8  }
   0xf   : > { %p33_p9 = scmp.eq.s32.totalorder %s32_s22, 0  ;;  %s442_s24 = sshll.u32 %s98_s23, 7 }
  0x10   : > { %s454_s25 = sshll.u32 %s654_s12, 5  ;;  %s102_s29 = scalar_lea.vmem [#allocation3], %s442_s24 }
  0x11   : > { %s742_s26 = scalar_select %p33_p9, %s638_s8, %s35_s17  }
  0x12   : > { %s108_s27 = sadd.s32 %s650_s11, %s454_s25  ;;  %s111_s30 = sshll.u32 %s102_s29, 4  ;;  %s750_s30 = int_to_ptr.vmem [resolvable:$true] %s111_s30 }
  0x13   : > { %s445_s28 = sshll.u32 %s108_s27, 7  ;;  %p756_p10 = pnand %p461_p8, %p726_p5 }
  0x14   : > { %s748_s4 = scalar_lea.hbm %s913_s0, %s445_s28  ;;  %s761_s6 = scalar_lea.sflag [#allocation4], %s98_s23 }
  0x15   : > { %s562_s14 = scalar_lea.hbm %s748_s4, 2048  ;;  %p564_p13 = pneg %p756_p10 }
  0x16   : > { %p563_p12 = scmp.ne.s32.totalorder %s748_s4, %s562_s14  ;;  %s567_s19 = scalar_lea.hbm %s913_s0, 8192 }
  0x17   : > { %p568_p2 = scmp.lt.u32.totalorder %s748_s4, %s913_s0  ;;  %p569_p3 = scmp.lt.u32.totalorder %s567_s19, %s562_s14 }
  0x18   : > { %p565_p0 = pnand %p564_p13, %p563_p12  ;;  %p571_p5 = scmp.lt.u32.totalorder %s562_s14, %s748_s4 }
  0x19   : > { %p570_p4 = por %p569_p3, %p568_p2 }
  0x1a   : > { %p566_p1 = pneg %p565_p0 }
  0x1b   : > { %p572_p6 = por %p571_p5, %p570_p4 }
  0x1d   : > { %p573_p8 = pnand %p572_p6, %p566_p1 }
  0x1f   : > { %576 = shalt.err (!%p573_p8)
}
  0x20   : > { %s577_s23 = scalar_lea.vmem %s750_s30, 2048  ;;  %s660_s24 = smov [#allocation3]  }
  0x21   : > { %p578_p9 = scmp.ne.s32.totalorder %s750_s30, %s577_s23  ;;  %s582_s25 = sshll.u32 %s660_s24, 4  ;;  %s583_s25 = int_to_ptr.vmem [resolvable:$false] %s582_s25 }
  0x22   : > { %s584_s27 = scalar_lea.vmem %s583_s25, 4096  ;;  %p585_p11 = scmp.lt.s32.totalorder %s750_s30, %s583_s25 }
  0x23   : > { %p580_p12 = pnand %p578_p9, %p564_p13  ;;  %p586_p2 = scmp.lt.s32.totalorder %s584_s27, %s577_s23 }
  0x25   : > { %p581_p0 = pneg %p580_p12  ;;  %p587_p3 = por %p586_p2, %p585_p11 }
  0x27   : > { %p588_p4 = pnand %p587_p3, %p581_p0 }
  0x29   : > { %591 = shalt.err (!%p588_p4)
}
  0x2a   : > { %s661_s28 = smov 256   ;;  %s662_s29 = smov 128  }
  0x2b   : > { %s663_s2 = smov 8   ;;  %p119_p13 = scmp.lt.s32.totalorder %s658_s13, 5 }
  0x2c   : > { %460 = dma.hbm_to_vmem [thread:$0]  (!%p756_p10), %s748_s4, 2048, %s750_s30, %s761_s6, %s661_s28, %s662_s29, %s663_s2  }
  0x2d   : > { %p918_p1 = scmp.ge.s32.totalorder %s658_s13, 1 }
  0x2f   : > { %p120_p5 = pnand %p918_p1, %p119_p13 }
  0x30   : > { %s125_s3 = sand.u32 (!%p120_p5), 1, %s634_s7  }
  0x31   : > { %123 = sbr.rel (%p120_p5) target bundleno = 262 (0x106), region = 24  ;;  %s447_s14 = sshll.u32 (!%p120_p5), %s125_s3, 7 }
  0x32   : > { %s126_s17 = scalar_lea.sflag (!%p120_p5), [#allocation4], %s125_s3  ;;  %s793_s18 = scalar_lea.vmem (!%p120_p5), [#allocation3], %s447_s14 }
  0x38   : > { %625 = dma.done.wait (%p732_p7), %s126_s17, 2048  }
  0x39   : > { %627 = vsyncadd (%p732_p7), %s126_s17, 4294965248  ;;  %s448_s19 = sshll.u32 %s646_s10, 4  ;;  %p450_p10 = scmp.ne.s32.totalorder %s642_s9, 0 }
  0x3a   : > { %p150_p11 = scmp.lt.s32.totalorder %s448_s19, 31  ;;  %vm159_vm0 = vcmask (!%p450_p10), 7168   ;;  %v664_v0 = vmov (!%p450_p10), 0.0  }
  0x3b   : > { %158 = sbr.rel (%p450_p10) target bundleno = 67 (0x43), region = 32  ;;  %160 = vst.msk [vmem:[#allocation2] sm:$0xff] (!%p450_p10), %vm159_vm0, %v664_v0  ;;  %161 = vst.msk [vmem:[#allocation2 + $0x8] sm:$0xff] (!%p450_p10), %vm159_vm0, %v664_v0 }
  0x3c   : > { %s933_s19 = smov (!%p150_p11, %s448_s19), 31  ;;  %162 = vst.msk [vmem:[#allocation2 + $0x10] sm:$0xff] (!%p450_p10), %vm159_vm0, %v664_v0  ;;  %163 = vst.msk [vmem:[#allocation2 + $0x18] sm:$0xff] (!%p450_p10), %vm159_vm0, %v664_v0 }
  0x3d   : > { %s449_s30 = sshll.u32 %s933_s19, 3  ;;  %164 = vst.msk [vmem:[#allocation2 + $0x20] sm:$0xff] (!%p450_p10), %vm159_vm0, %v664_v0  ;;  %165 = vst.msk [vmem:[#allocation2 + $0x28] sm:$0xff] (!%p450_p10), %vm159_vm0, %v664_v0 }
  0x3e   : > { %s803_s6 = scalar_lea.vmem %s914_s1, %s449_s30  ;;  %166 = vst.msk [vmem:[#allocation2 + $0x30] sm:$0xff] (!%p450_p10), %vm159_vm0, %v664_v0  ;;  %167 = vst.msk [vmem:[#allocation2 + $0x38] sm:$0xff] (!%p450_p10), %vm159_vm0, %v664_v0 }
  0x3f   : > { %168 = vst.msk [vmem:[#allocation2 + $0x40] sm:$0xff] (!%p450_p10), %vm159_vm0, %v664_v0  ;;  %169 = vst.msk [vmem:[#allocation2 + $0x48] sm:$0xff] (!%p450_p10), %vm159_vm0, %v664_v0 }
  0x40   : > { %170 = vst.msk [vmem:[#allocation2 + $0x50] sm:$0xff] (!%p450_p10), %vm159_vm0, %v664_v0  ;;  %171 = vst.msk [vmem:[#allocation2 + $0x58] sm:$0xff] (!%p450_p10), %vm159_vm0, %v664_v0 }
  0x41   : > { %172 = vst.msk [vmem:[#allocation2 + $0x60] sm:$0xff] (!%p450_p10), %vm159_vm0, %v664_v0  ;;  %173 = vst.msk [vmem:[#allocation2 + $0x68] sm:$0xff] (!%p450_p10), %vm159_vm0, %v664_v0 }
  0x42   : > { %174 = vst.msk [vmem:[#allocation2 + $0x70] sm:$0xff] %vm159_vm0, %v664_v0  ;;  %175 = vst.msk [vmem:[#allocation2 + $0x78] sm:$0xff] %vm159_vm0, %v664_v0 }
  0x43 PF: > { %v194_v1 = vld [vmem:[%s793_s18 + $0x10] sm:$0xff]  ;;  %v192_v2 = vld [vmem:[%s793_s18] sm:$0xff]  ;;  %v195_v3 = vld [vmem:[%s793_s18 + $0x18] sm:$0xff]  ;;  %vm256_vm1 = vcmask 7168   ;;  %p451_p7 = scmp.ne.s32.totalorder %s642_s9, 1 }
  0x44   : > { %212 = vadd.xlane.f32.xlu1 %v194_v1  ;;  %208 = vadd.xlane.f32.xlu0 %v192_v2  ;;  %v193_v4 = vld [vmem:[%s793_s18 + $0x8] sm:$0xff]  ;;  %v196_v6 = vld [vmem:[%s793_s18 + $0x20] sm:$0xff]  ;;  %v199_v7 = vld [vmem:[%s793_s18 + $0x38] sm:$0xff] }
  0x45   : > { %v197_v5 = vld [vmem:[%s793_s18 + $0x28] sm:$0xff]  ;;  %v198_v8 = vld [vmem:[%s793_s18 + $0x30] sm:$0xff]  ;;  %v200_v10 = vld [vmem:[%s793_s18 + $0x40] sm:$0xff] }
  0x46   : > { %v201_v9 = vld [vmem:[%s793_s18 + $0x48] sm:$0xff]  ;;  %v203_v11 = vld [vmem:[%s793_s18 + $0x58] sm:$0xff]  ;;  %v202_v12 = vld [vmem:[%s793_s18 + $0x50] sm:$0xff] }
  0x47   : > { %v205_v13 = vld [vmem:[%s793_s18 + $0x68] sm:$0xff]  ;;  %v204_v14 = vld [vmem:[%s793_s18 + $0x60] sm:$0xff]  ;;  %v207_v15 = vld [vmem:[%s793_s18 + $0x78] sm:$0xff] }
  0x48   : > { %214 = vadd.xlane.f32.xlu1 %v195_v3  ;;  %210 = vadd.xlane.f32.xlu0 %v193_v4  ;;  %v206_v16 = vld [vmem:[%s793_s18 + $0x70] sm:$0xff]  ;;  %v176_v18 = vld [vmem:[#allocation2] sm:$0xff]  ;;  %v179_v23 = vld [vmem:[#allocation2 + $0x18] sm:$0xff] }
  0x49   : > { %v178_v17 = vld [vmem:[#allocation2 + $0x10] sm:$0xff]  ;;  %v177_v24 = vld [vmem:[#allocation2 + $0x8] sm:$0xff]  ;;  %v180_v30 = vld [vmem:[#allocation2 + $0x20] sm:$0xff] }
  0x4a   : > { %v181_v29 = vld [vmem:[#allocation2 + $0x28] sm:$0xff]  ;;  %v183_v35 = vld [vmem:[#allocation2 + $0x38] sm:$0xff]  ;;  %v182_v36 = vld [vmem:[#allocation2 + $0x30] sm:$0xff] }
  0x4b   : > { %v185_v41 = vld [vmem:[#allocation2 + $0x48] sm:$0xff]  ;;  %v184_v42 = vld [vmem:[#allocation2 + $0x40] sm:$0xff]  ;;  %v187_v47 = vld [vmem:[#allocation2 + $0x58] sm:$0xff] }
  0x4c   : > { %218 = vadd.xlane.f32.xlu1 %v197_v5  ;;  %216 = vadd.xlane.f32.xlu0 %v196_v6  ;;  %v186_v48 = vld [vmem:[#allocation2 + $0x50] sm:$0xff]  ;;  %v189_v53 = vld [vmem:[#allocation2 + $0x68] sm:$0xff]  ;;  %v188_v54 = vld [vmem:[#allocation2 + $0x60] sm:$0xff] }
  0x4d   : > { %v191_v59 = vld [vmem:[#allocation2 + $0x78] sm:$0xff]  ;;  %v190_v60 = vld [vmem:[#allocation2 + $0x70] sm:$0xff] }
  0x50   : > { %222 = vadd.xlane.f32.xlu1 %v199_v7  ;;  %220 = vadd.xlane.f32.xlu0 %v198_v8 }
  0x54   : > { %226 = vadd.xlane.f32.xlu1 %v201_v9  ;;  %224 = vadd.xlane.f32.xlu0 %v200_v10 }
  0x58   : > { %230 = vadd.xlane.f32.xlu1 %v203_v11  ;;  %228 = vadd.xlane.f32.xlu0 %v202_v12 }
  0x5c   : > { %234 = vadd.xlane.f32.xlu1 %v205_v13  ;;  %232 = vadd.xlane.f32.xlu0 %v204_v14 }
  0x60   : > { %238 = vadd.xlane.f32.xlu1 %v207_v15  ;;  %236 = vadd.xlane.f32.xlu0 %v206_v16 }
  0xd1   : > { %v213_v19 = vpop.xlane.xlu1 %212  ;;  %v209_v20 = vpop.xlane.xlu0 %208 }
  0xd2   : > { %v242_v21 = vadd.f32 %v213_v19, %v178_v17  ;;  %v240_v22 = vadd.f32 %v209_v20, %v176_v18 }
  0xd4   : > { %259 = vst.msk [vmem:[#allocation2 + $0x10] sm:$0xff] %vm256_vm1, %v242_v21  ;;  %257 = vst.msk [vmem:[#allocation2] sm:$0xff] %vm256_vm1, %v240_v22 }
  0xd5   : > { %v215_v25 = vpop.xlane.xlu1 %214  ;;  %v211_v26 = vpop.xlane.xlu0 %210 }
  0xd6   : > { %v243_v27 = vadd.f32 %v215_v25, %v179_v23  ;;  %v241_v28 = vadd.f32 %v211_v26, %v177_v24 }
  0xd8   : > { %260 = vst.msk [vmem:[#allocation2 + $0x18] sm:$0xff] %vm256_vm1, %v243_v27  ;;  %258 = vst.msk [vmem:[#allocation2 + $0x8] sm:$0xff] %vm256_vm1, %v241_v28 }
  0xd9   : > { %v219_v31 = vpop.xlane.xlu1 %218  ;;  %v217_v32 = vpop.xlane.xlu0 %216 }
  0xda   : > { %v245_v33 = vadd.f32 %v219_v31, %v181_v29  ;;  %v244_v34 = vadd.f32 %v217_v32, %v180_v30 }
  0xdb   : > { %v277_v1 = vld [vmem:[#allocation2] sm:$0xff] (!%p451_p7)  ;;  %v279_v3 = vld [vmem:[#allocation2 + $0x10] sm:$0xff] (!%p451_p7) }
  0xdc   : > { %262 = vst.msk [vmem:[#allocation2 + $0x28] sm:$0xff] %vm256_vm1, %v245_v33  ;;  %261 = vst.msk [vmem:[#allocation2 + $0x20] sm:$0xff] %vm256_vm1, %v244_v34  ;;  %530 = vrsqrt.f32 (!%p451_p7), %v277_v1  ;;  %vm293_vm2 = vcmp.gt.f32.partialorder (!%p451_p7), %v277_v1, 0.0  ;;  %vm295_vm4 = vcmp.gt.f32.partialorder (!%p451_p7), %v279_v3, 0.0 }
  0xdd   : > { %v223_v37 = vpop.xlane.xlu1 %222  ;;  %v221_v38 = vpop.xlane.xlu0 %220 }
  0xde   : > { %v247_v39 = vadd.f32 %v223_v37, %v183_v35  ;;  %v246_v40 = vadd.f32 %v221_v38, %v182_v36 }
  0xdf   : > { %v278_v2 = vld [vmem:[#allocation2 + $0x8] sm:$0xff] (!%p451_p7)  ;;  %v280_v4 = vld [vmem:[#allocation2 + $0x18] sm:$0xff] (!%p451_p7) }
  0xe0   : > { %264 = vst.msk [vmem:[#allocation2 + $0x38] sm:$0xff] %vm256_vm1, %v247_v39  ;;  %263 = vst.msk [vmem:[#allocation2 + $0x30] sm:$0xff] %vm256_vm1, %v246_v40  ;;  %532 = vrsqrt.f32 (!%p451_p7), %v278_v2  ;;  %vm294_vm3 = vcmp.gt.f32.partialorder (!%p451_p7), %v278_v2, 0.0  ;;  %vm296_vm5 = vcmp.gt.f32.partialorder (!%p451_p7), %v280_v4, 0.0 }
  0xe1   : > { %v227_v43 = vpop.xlane.xlu1 %226  ;;  %v225_v44 = vpop.xlane.xlu0 %224  ;;  %534 = vrsqrt.f32 (!%p451_p7), %v279_v3 }
  0xe2   : > { %v249_v45 = vadd.f32 %v227_v43, %v185_v41  ;;  %v248_v46 = vadd.f32 %v225_v44, %v184_v42  ;;  %536 = vrsqrt.f32 (!%p451_p7), %v280_v4 }
  0xe3   : > { %v281_v5 = vld [vmem:[#allocation2 + $0x20] sm:$0xff] (!%p451_p7)  ;;  %v282_v6 = vld [vmem:[#allocation2 + $0x28] sm:$0xff] (!%p451_p7) }
  0xe4   : > { %266 = vst.msk [vmem:[#allocation2 + $0x48] sm:$0xff] %vm256_vm1, %v249_v45  ;;  %265 = vst.msk [vmem:[#allocation2 + $0x40] sm:$0xff] %vm256_vm1, %v248_v46  ;;  %538 = vrsqrt.f32 (!%p451_p7), %v281_v5  ;;  %vm297_vm6 = vcmp.gt.f32.partialorder (!%p451_p7), %v281_v5, 0.0  ;;  %vm298_vm7 = vcmp.gt.f32.partialorder (!%p451_p7), %v282_v6, 0.0 }
  0xe5   : > { %v231_v49 = vpop.xlane.xlu1 %230  ;;  %v229_v50 = vpop.xlane.xlu0 %228  ;;  %540 = vrsqrt.f32 (!%p451_p7), %v282_v6 }
  0xe6   : > { %v251_v51 = vadd.f32 %v231_v49, %v187_v47  ;;  %v250_v52 = vadd.f32 %v229_v50, %v186_v48  ;;  %v531_v14 = vpop.eup (!%p451_p7), %530 }
  0xe7   : > { %v283_v7 = vld [vmem:[#allocation2 + $0x30] sm:$0xff] (!%p451_p7)  ;;  %v284_v8 = vld [vmem:[#allocation2 + $0x38] sm:$0xff] (!%p451_p7)  ;;  %v325_v17 = vsel (!%p451_p7), %vm293_vm2, %v531_v14, 0.0 }
  0xe8   : > { %268 = vst.msk [vmem:[#allocation2 + $0x58] sm:$0xff] %vm256_vm1, %v251_v51  ;;  %267 = vst.msk [vmem:[#allocation2 + $0x50] sm:$0xff] %vm256_vm1, %v250_v52  ;;  %542 = vrsqrt.f32 (!%p451_p7), %v283_v7  ;;  %vm299_vm8 = vcmp.gt.f32.partialorder (!%p451_p7), %v283_v7, 0.0  ;;  %vm300_vm9 = vcmp.gt.f32.partialorder (!%p451_p7), %v284_v8, 0.0 }
  0xe9   : > { %v235_v55 = vpop.xlane.xlu1 %234  ;;  %v233_v56 = vpop.xlane.xlu0 %232  ;;  %544 = vrsqrt.f32 (!%p451_p7), %v284_v8  ;;  %341 = vst.msk [vmem:[%s803_s6] sm:$0xff] (!%p451_p7), %vm256_vm1, %v325_v17 }
  0xea   : > { %v253_v57 = vadd.f32 %v235_v55, %v189_v53  ;;  %v252_v58 = vadd.f32 %v233_v56, %v188_v54  ;;  %276 = sbr.rel (%p451_p7) target bundleno = 262 (0x106), region = 36  ;;  %v533_v16 = vpop.eup (!%p451_p7), %532 }
  0xeb   : > { %v285_v9 = vld [vmem:[#allocation2 + $0x40] sm:$0xff] (!%p451_p7)  ;;  %v286_v10 = vld [vmem:[#allocation2 + $0x48] sm:$0xff] (!%p451_p7)  ;;  %v535_v19 = vpop.eup (!%p451_p7), %534  ;;  %v326_v20 = vsel (!%p451_p7), %vm294_vm3, %v533_v16, 0.0 }
  0xec   : > { %270 = vst.msk [vmem:[#allocation2 + $0x68] sm:$0xff] %vm256_vm1, %v253_v57  ;;  %269 = vst.msk [vmem:[#allocation2 + $0x60] sm:$0xff] %vm256_vm1, %v252_v58  ;;  %546 = vrsqrt.f32 (!%p451_p7), %v285_v9  ;;  %v537_v22 = vpop.eup (!%p451_p7), %536  ;;  %v327_v23 = vsel (!%p451_p7), %vm295_vm4, %v535_v19, 0.0  ;;  %vm301_vm10 = vcmp.gt.f32.partialorder (!%p451_p7), %v285_v9, 0.0  ;;  %vm302_vm11 = vcmp.gt.f32.partialorder (!%p451_p7), %v286_v10, 0.0 }
  0xed   : > { %v239_v61 = vpop.xlane.xlu1 %238  ;;  %v237_v62 = vpop.xlane.xlu0 %236  ;;  %548 = vrsqrt.f32 (!%p451_p7), %v286_v10  ;;  %342 = vst.msk [vmem:[%s803_s6 + $0x8] sm:$0xff] (!%p451_p7), %vm256_vm1, %v326_v20  ;;  %343 = vst.msk [vmem:[%s803_s6 + $0x10] sm:$0xff] (!%p451_p7), %vm256_vm1, %v327_v23  ;;  %v328_v25 = vsel (!%p451_p7), %vm296_vm5, %v537_v22, 0.0 }
  0xee   : > { %v255_v63 = vadd.f32 %v239_v61, %v191_v59  ;;  %v254_v0 = vadd.f32 %v237_v62, %v190_v60  ;;  %v539_v24 = vpop.eup (!%p451_p7), %538  ;;  %344 = vst.msk [vmem:[%s803_s6 + $0x18] sm:$0xff] (!%p451_p7), %vm256_vm1, %v328_v25 }
  0xef   : > { %v287_v11 = vld [vmem:[#allocation2 + $0x50] sm:$0xff] (!%p451_p7)  ;;  %v288_v12 = vld [vmem:[#allocation2 + $0x58] sm:$0xff] (!%p451_p7)  ;;  %v541_v26 = vpop.eup (!%p451_p7), %540  ;;  %v329_v27 = vsel (!%p451_p7), %vm297_vm6, %v539_v24, 0.0 }
  0xf0   : > { %272 = vst.msk [vmem:[#allocation2 + $0x78] sm:$0xff] %vm256_vm1, %v255_v63  ;;  %271 = vst.msk [vmem:[#allocation2 + $0x70] sm:$0xff] %vm256_vm1, %v254_v0  ;;  %550 = vrsqrt.f32 (!%p451_p7), %v287_v11  ;;  %v330_v29 = vsel (!%p451_p7), %vm298_vm7, %v541_v26, 0.0  ;;  %vm303_vm12 = vcmp.gt.f32.partialorder (!%p451_p7), %v287_v11, 0.0  ;;  %vm304_vm13 = vcmp.gt.f32.partialorder (!%p451_p7), %v288_v12, 0.0 }
  0xf1   : > { %552 = vrsqrt.f32 %v288_v12  ;;  %345 = vst.msk [vmem:[%s803_s6 + $0x20] sm:$0xff] %vm256_vm1, %v329_v27  ;;  %346 = vst.msk [vmem:[%s803_s6 + $0x28] sm:$0xff] %vm256_vm1, %v330_v29 }
  0xf2   : > { %v543_v28 = vpop.eup %542 }
  0xf3   : > { %v289_v13 = vld [vmem:[#allocation2 + $0x60] sm:$0xff]  ;;  %v290_v15 = vld [vmem:[#allocation2 + $0x68] sm:$0xff]  ;;  %v545_v30 = vpop.eup %544  ;;  %v331_v31 = vsel %vm299_vm8, %v543_v28, 0.0 }
  0xf4   : > { %554 = vrsqrt.f32 %v289_v13  ;;  %347 = vst.msk [vmem:[%s803_s6 + $0x30] sm:$0xff] %vm256_vm1, %v331_v31  ;;  %v332_v33 = vsel %vm300_vm9, %v545_v30, 0.0  ;;  %vm305_vm14 = vcmp.gt.f32.partialorder %v289_v13, 0.0  ;;  %vm306_vm15 = vcmp.gt.f32.partialorder %v290_v15, 0.0 }
  0xf5   : > { %556 = vrsqrt.f32 %v290_v15  ;;  %348 = vst.msk [vmem:[%s803_s6 + $0x38] sm:$0xff] %vm256_vm1, %v332_v33 }
  0xf6   : > { %v547_v32 = vpop.eup %546 }
  0xf7   : > { %v291_v18 = vld [vmem:[#allocation2 + $0x70] sm:$0xff]  ;;  %v292_v21 = vld [vmem:[#allocation2 + $0x78] sm:$0xff]  ;;  %v549_v34 = vpop.eup %548  ;;  %v333_v35 = vsel %vm301_vm10, %v547_v32, 0.0 }
  0xf8   : > { %558 = vrsqrt.f32 %v291_v18  ;;  %349 = vst.msk [vmem:[%s803_s6 + $0x40] sm:$0xff] %vm256_vm1, %v333_v35  ;;  %v334_v37 = vsel %vm302_vm11, %v549_v34, 0.0  ;;  %vm307_vm0 = vcmp.gt.f32.partialorder %v291_v18, 0.0  ;;  %vm308_vm2 = vcmp.gt.f32.partialorder %v292_v21, 0.0 }
  0xf9   : > { %560 = vrsqrt.f32 %v292_v21  ;;  %350 = vst.msk [vmem:[%s803_s6 + $0x48] sm:$0xff] %vm256_vm1, %v334_v37 }
  0xfa   : > { %v551_v36 = vpop.eup %550 }
  0xfb   : > { %v553_v38 = vpop.eup %552  ;;  %v335_v39 = vsel %vm303_vm12, %v551_v36, 0.0 }
  0xfc   : > { %351 = vst.msk [vmem:[%s803_s6 + $0x50] sm:$0xff] %vm256_vm1, %v335_v39  ;;  %v336_v41 = vsel %vm304_vm13, %v553_v38, 0.0 }
  0xfd   : > { %352 = vst.msk [vmem:[%s803_s6 + $0x58] sm:$0xff] %vm256_vm1, %v336_v41 }
  0xfe   : > { %v555_v40 = vpop.eup %554 }
  0xff   : > { %v557_v42 = vpop.eup %556  ;;  %v337_v43 = vsel %vm305_vm14, %v555_v40, 0.0 }
 0x100   : > { %353 = vst.msk [vmem:[%s803_s6 + $0x60] sm:$0xff] %vm256_vm1, %v337_v43  ;;  %v338_v45 = vsel %vm306_vm15, %v557_v42, 0.0 }
 0x101   : > { %354 = vst.msk [vmem:[%s803_s6 + $0x68] sm:$0xff] %vm256_vm1, %v338_v45 }
 0x102   : > { %v559_v44 = vpop.eup %558 }
 0x103   : > { %v561_v46 = vpop.eup %560  ;;  %v339_v47 = vsel %vm307_vm0, %v559_v44, 0.0 }
 0x104   : > { %355 = vst.msk [vmem:[%s803_s6 + $0x70] sm:$0xff] %vm256_vm1, %v339_v47  ;;  %v340_v48 = vsel %vm308_vm2, %v561_v46, 0.0 }
 0x105   : > { %356 = vst.msk [vmem:[%s803_s6 + $0x78] sm:$0xff] %vm256_vm1, %v340_v48 }
 0x106 PF: > { %s14_s13 = sadd.s32 1, %s658_s13   ;;  %s919_s6 = smov %s634_s7 }
 0x107   : > { %p11_p6 = scmp.ge.s32.totalorder %s14_s13, 6   ;;  %s920_s7 = smov %s638_s8 }
 0x108   : > { %s921_s8 = smov %s742_s26  ;;  %s922_s9 = smov %s650_s11 }
 0x109   : > { %s923_s10 = smov %s654_s12  ;;  %s924_s11 = smov %s927_s15 }
 0x10a   : > { %s925_s12 = smov %s931_s16  ;;  %13 = sbr.rel (!%p11_p6) target bundleno = 5 (0x5), region = 72 }
 0x111   :  { %379 = vsyncpa [#allocation4], 1 }
 0x112   :  { %381 = vsyncpa [#allocation4 + $0x1], 1 }

</bundles_post_ra>
